<compile_context>
chip_gen: v6e
topology: v6e:2x2x1
jax: 0.10.0
libtpu: 0.0.40
codegen_flags: <defaults>
</compile_context>

<pallas_src>
import jax
import jax.numpy as jnp
from jax.experimental import pallas as pl
from jax.experimental.pallas import tpu as pltpu


# ----------------------------------------------------------------------------
# Fused Pallas kernel: embedding + attention encoder + pooling + classifier
# ----------------------------------------------------------------------------

def mlm_fused_kernel(tok_ref, amask_ref, pmask_ref, emb_ref, wqkv_ref, wo_ref,
                     wcls_ref, o_ref):
    """Fused forward for one batch tile.

    tok_ref:   (Bt, S, 1)    int32 token ids
    amask_ref: (Bt, 1, S)    attention mask (1.0 = keep, 0.0 = pad)
    pmask_ref: (Bt, S, 2)    [source_mask, target_mask] stacked on the lane axis
    emb_ref:   (V, H)        embedding table (stand-in for the HF embedder)
    wqkv_ref:  (H, 3H)       fused q/k/v projection weights
    wo_ref:    (H, H)        output projection
    wcls_ref:  (2H, 128)     classifier weight, transposed + zero-padded to 128 lanes
    o_ref:     (Bt, 1, 128)  logits slab; only [..., :3] is meaningful
    """
    tok = tok_ref[...]                                    # (Bt, S, 1) int32
    bt, s_len, _ = tok.shape
    v_size, h = emb_ref.shape

    # --- embedding lookup fused as a one-hot MXU matmul ----------------------
    # (exact: one-hot rows select table rows; no extra HBM round trip)
    iota_v = jax.lax.broadcasted_iota(jnp.int32, (bt, s_len, v_size), 2)
    onehot = (iota_v == tok).astype(jnp.float32)          # (Bt, S, V)
    x2 = jnp.dot(onehot.reshape(bt * s_len, v_size), emb_ref[...],
                 preferred_element_type=jnp.float32)      # (Bt*S, H)
    x = x2.reshape(bt, s_len, h)                          # (Bt, S, H)

    # --- fused q/k/v projection: one (Bt*S, H) @ (H, 3H) MXU matmul ----------
    qkv = jnp.dot(x2, wqkv_ref[...], preferred_element_type=jnp.float32)
    # H is a multiple of 128, so these lane slices are tile-aligned (free).
    q = qkv[:, 0 * h:1 * h].reshape(bt, s_len, h)
    k = qkv[:, 1 * h:2 * h].reshape(bt, s_len, h)
    v = qkv[:, 2 * h:3 * h].reshape(bt, s_len, h)

    # --- masked self-attention + residual ------------------------------------
    scale = 1.0 / jnp.sqrt(jnp.float32(h))
    am = amask_ref[...]                                   # (Bt, 1, S)
    s = jnp.einsum('bqd,bkd->bqk', q, k,
                   preferred_element_type=jnp.float32) * scale     # (Bt, S, S)
    s = s + (1.0 - am) * (-1e9)            # am broadcasts over the query axis

    m = jnp.max(s, axis=-1, keepdims=True)
    p = jnp.exp(s - m)
    p = p / jnp.sum(p, axis=-1, keepdims=True)            # exact division (f32)

    ctx = jnp.einsum('bqk,bkd->bqd', p, v,
                     preferred_element_type=jnp.float32)            # (Bt, S, H)
    seq = x + jnp.dot(ctx.reshape(bt * s_len, h), wo_ref[...],
                      preferred_element_type=jnp.float32).reshape(bt, s_len, h)

    # --- masked mean pooling: VPU multiply + XLU sublane reduce --------------
    pm = pmask_ref[...]                                   # (Bt, S, 2)
    sm = pm[:, :, 0:1]                                    # (Bt, S, 1), lane-broadcasts
    tm = pm[:, :, 1:2]
    src = jnp.sum(seq * sm, axis=1) / jnp.sum(sm, axis=1)  # (Bt, H)
    tgt = jnp.sum(seq * tm, axis=1) / jnp.sum(tm, axis=1)  # (Bt, H)
    feat = jnp.concatenate([src, tgt], axis=1)            # (Bt, 2H)

    # --- Linear(2H -> 3, bias=False), lane-padded to 128 output columns ------
    logits = jnp.dot(feat, wcls_ref[...],
                     preferred_element_type=jnp.float32)  # (Bt, 128), unmasked store
    o_ref[...] = logits[:, None, :]                       # (Bt, 1, 128)


# ----------------------------------------------------------------------------
# pallas_call wrapper
# ----------------------------------------------------------------------------

def run_mlm_fused(tok, amask, pmask, emb, wqkv, wo, wcls_pad, *, batch_tile=None):
    """tok: (B, S, 1) int32, amask: (B, 1, S), pmask: (B, S, 2) -> logits (B, 3)."""
    B, S, _ = tok.shape
    V, H = emb.shape
    out_pad = wcls_pad.shape[1]                           # 128 (lane-dense)
    if batch_tile is None:
        # Single grid step: v5e/v6e are single-TC chips, so a multi-step grid is
        # a sequential loop whose per-step overhead dominates at this size.
        batch_tile = B
    assert B % batch_tile == 0
    n_tiles = B // batch_tile

    out = pl.pallas_call(
        mlm_fused_kernel,
        out_shape=jax.ShapeDtypeStruct((B, 1, out_pad), jnp.float32),
        grid=(n_tiles,),
        in_specs=[
            pl.BlockSpec((batch_tile, S, 1), lambda i: (i, 0, 0)),
            pl.BlockSpec((batch_tile, 1, S), lambda i: (i, 0, 0)),
            pl.BlockSpec((batch_tile, S, 2), lambda i: (i, 0, 0)),
            pl.BlockSpec((V, H), lambda i: (0, 0)),
            pl.BlockSpec((H, 3 * H), lambda i: (0, 0)),
            pl.BlockSpec((H, H), lambda i: (0, 0)),
            pl.BlockSpec((2 * H, out_pad), lambda i: (0, 0)),
        ],
        out_specs=pl.BlockSpec((batch_tile, 1, out_pad), lambda i: (i, 0, 0)),
        compiler_params=pltpu.CompilerParams(
            dimension_semantics=("arbitrary",),
            vmem_limit_bytes=32 * 1024 * 1024),
    )(tok, amask, pmask, emb, wqkv, wo, wcls_pad)
    return out[:, 0, :3]                                  # (B, 3)


# ----------------------------------------------------------------------------
# Model (parameters + forward, mirroring MlmBaseModel)
# ----------------------------------------------------------------------------

class MlmBaseModelPallas:
    def __init__(self, key, vocab_size=128, hidden_dim=128):
        # hidden_dim and vocab_size kept at multiples of 128 (lane alignment).
        self.hidden_dim = hidden_dim
        self.vocab_size = vocab_size
        k = jax.random.split(key, 6)
        s = 0.02
        self.emb_table = s * jax.random.normal(k[0], (vocab_size, hidden_dim), jnp.float32)
        self.wq = s * jax.random.normal(k[1], (hidden_dim, hidden_dim), jnp.float32)
        self.wk = s * jax.random.normal(k[2], (hidden_dim, hidden_dim), jnp.float32)
        self.wv = s * jax.random.normal(k[3], (hidden_dim, hidden_dim), jnp.float32)
        self.wo = s * jax.random.normal(k[4], (hidden_dim, hidden_dim), jnp.float32)
        # torch.nn.Linear(hidden_dim * 2, 3, bias=False) -> weight (3, 2H)
        self.w_cls = s * jax.random.normal(k[5], (3, 2 * hidden_dim), jnp.float32)

        # Precomputed fused / transposed / lane-padded weights (once, not per forward).
        self.wqkv = jnp.concatenate([self.wq, self.wk, self.wv], axis=1)   # (H, 3H)
        self.w_cls_pad = jnp.zeros((2 * hidden_dim, 128), jnp.float32)
        self.w_cls_pad = self.w_cls_pad.at[:, :3].set(jnp.transpose(self.w_cls))

    def forward(self, tok1, am1, sm1, tm1, tok2, am2, sm2, tm2):
        """Both sentences processed in ONE fused pallas_call (stacked on batch)."""
        B = tok1.shape[0]
        tok = jnp.concatenate([tok1, tok2], axis=0).astype(jnp.int32)[:, :, None]  # (2B,S,1)
        am = jnp.concatenate([am1, am2], axis=0).astype(jnp.float32)[:, None, :]   # (2B,1,S)
        sm = jnp.concatenate([sm1, sm2], axis=0).astype(jnp.float32)
        tm = jnp.concatenate([tm1, tm2], axis=0).astype(jnp.float32)
        pm = jnp.stack([sm, tm], axis=2)                                           # (2B,S,2)

        logits = run_mlm_fused(tok, am, pm, self.emb_table, self.wqkv, self.wo,
                               self.w_cls_pad)
        # dropout is identity in eval mode
        return logits[:B], logits[B:]

    # pure-JAX reference of the same forward (for correctness check)
    def ref_forward_one_sentence(self, token_ids, attention_mask, source_mask, target_mask):
        x = jnp.take(self.emb_table, token_ids, axis=0).astype(jnp.float32)
        am = attention_mask.astype(jnp.float32)
        q = x @ self.wq; k = x @ self.wk; v = x @ self.wv
        s = jnp.einsum('bqd,bkd->bqk', q, k) / jnp.sqrt(jnp.float32(self.hidden_dim))
        s = s + (1.0 - am)[:, None, :] * (-1e9)
        p = jax.nn.softmax(s, axis=-1)
        seq = x + jnp.einsum('bqk,bkd->bqd', p, v) @ self.wo
        smf = source_mask.astype(jnp.float32)
        tmf = target_mask.astype(jnp.float32)
        src = (seq * smf[:, :, None]).sum(1) / smf.sum(1, keepdims=True)
        tgt = (seq * tmf[:, :, None]).sum(1) / tmf.sum(1, keepdims=True)
        feat = jnp.concatenate([src, tgt], axis=1)
        return feat @ self.w_cls.T


# ----------------------------------------------------------------------------
# main
# ----------------------------------------------------------------------------

if __name__ == "__main__":
    B, S, H, V = 2, 8, 128, 128
    key = jax.random.PRNGKey(0)
    kp, k1, k2 = jax.random.split(key, 3)

    model = MlmBaseModelPallas(kp, vocab_size=V, hidden_dim=H)

    tok1 = jax.random.randint(k1, (B, S), 0, V, dtype=jnp.int32)
    tok2 = jax.random.randint(k2, (B, S), 0, V, dtype=jnp.int32)

    # attention over whole sequence; source span = first half, target span = second half
    am = jnp.ones((B, S), jnp.float32)
    sm = jnp.concatenate([jnp.ones((B, S // 2), jnp.float32),
                          jnp.zeros((B, S // 2), jnp.float32)], axis=1)
    tm = 1.0 - sm

    out1, out2 = model.forward(tok1, am, sm, tm, tok2, am, sm, tm)
    jax.block_until_ready((out1, out2))

    ref1 = model.ref_forward_one_sentence(tok1, am, sm, tm)
    ref2 = model.ref_forward_one_sentence(tok2, am, sm, tm)

    assert out1.shape == (B, 3) and out2.shape == (B, 3)
    assert jnp.allclose(out1, ref1, atol=1e-5, rtol=1e-4)
    assert jnp.allclose(out2, ref2, atol=1e-5, rtol=1e-4)

    print("KERNEL_OK")
</pallas_src>

<mosaic_0001>
module attributes {stable_mosaic.version = 11 : i64} {
  func.func @mlm_fused_kernel(%arg0: i32, %arg1: memref<4x8x1xi32, #tpu.memory_space<vmem>>, %arg2: memref<4x1x8xf32, #tpu.memory_space<vmem>>, %arg3: memref<4x8x2xf32, #tpu.memory_space<vmem>>, %arg4: memref<128x128xf32, #tpu.memory_space<vmem>>, %arg5: memref<128x384xf32, #tpu.memory_space<vmem>>, %arg6: memref<128x128xf32, #tpu.memory_space<vmem>>, %arg7: memref<256x128xf32, #tpu.memory_space<vmem>>, %arg8: memref<4x1x128xf32, #tpu.memory_space<vmem>>) attributes {dimension_semantics = [#tpu.dimension_semantics<arbitrary>], iteration_bounds = array<i64: 1>, scalar_prefetch = 0 : i64, scratch_operands = 0 : i64, tpu.core_type = #tpu.core_type<tc>, window_params = [{transform_indices = @transform_0, window_bounds = array<i64: 4, 8, 1>}, {transform_indices = @transform_1, window_bounds = array<i64: 4, 1, 8>}, {transform_indices = @transform_2, window_bounds = array<i64: 4, 8, 2>}, {pipeline_mode = #tpu.pipeline_mode<synchronous>, transform_indices = @transform_3, window_bounds = array<i64: 128, 128>}, {pipeline_mode = #tpu.pipeline_mode<synchronous>, transform_indices = @transform_4, window_bounds = array<i64: 128, 384>}, {pipeline_mode = #tpu.pipeline_mode<synchronous>, transform_indices = @transform_5, window_bounds = array<i64: 128, 128>}, {pipeline_mode = #tpu.pipeline_mode<synchronous>, transform_indices = @transform_6, window_bounds = array<i64: 256, 128>}, {transform_indices = @transform_7, window_bounds = array<i64: 4, 1, 128>}]} {
    %c0 = arith.constant 0 : index
    %c0_0 = arith.constant 0 : index
    %c0_1 = arith.constant 0 : index
    %0 = vector.load %arg1[%c0, %c0_0, %c0_1] : memref<4x8x1xi32, #tpu.memory_space<vmem>>, vector<4x8x1xi32>
    %1 = tpu.iota {dimensions = array<i32: 2>} : vector<4x8x128xi32>
    %2 = vector.broadcast %0 : vector<4x8x1xi32> to vector<4x8x128xi32>
    %3 = arith.cmpi eq, %1, %2 : vector<4x8x128xi32>
    %4 = arith.extui %3 : vector<4x8x128xi1> to vector<4x8x128xi32>
    %5 = arith.sitofp %4 : vector<4x8x128xi32> to vector<4x8x128xf32>
    %6 = vector.shape_cast %5 : vector<4x8x128xf32> to vector<32x128xf32>
    %c0_2 = arith.constant 0 : index
    %c0_3 = arith.constant 0 : index
    %7 = vector.load %arg4[%c0_2, %c0_3] : memref<128x128xf32, #tpu.memory_space<vmem>>, vector<128x128xf32>
    %cst = arith.constant dense<0.000000e+00> : vector<32x128xf32>
    %8 = tpu.matmul %6, %7, %cst {dimension_numbers = #tpu.dot_dimension_numbers<[1], [0], [0], [1], [0, 0, 1, 1], [], []>} : vector<32x128xf32>, vector<128x128xf32>, vector<32x128xf32> -> vector<32x128xf32>
    %9 = vector.shape_cast %8 : vector<32x128xf32> to vector<4x8x128xf32>
    %c0_4 = arith.constant 0 : index
    %c0_5 = arith.constant 0 : index
    %10 = vector.load %arg5[%c0_4, %c0_5] : memref<128x384xf32, #tpu.memory_space<vmem>>, vector<128x384xf32>
    %cst_6 = arith.constant dense<0.000000e+00> : vector<32x384xf32>
    %11 = tpu.matmul %8, %10, %cst_6 {dimension_numbers = #tpu.dot_dimension_numbers<[1], [0], [0], [1], [0, 0, 1, 1], [], []>} : vector<32x128xf32>, vector<128x384xf32>, vector<32x384xf32> -> vector<32x384xf32>
    %12 = vector.extract_strided_slice %11 {offsets = [0, 0], sizes = [32, 128], strides = [1, 1]} : vector<32x384xf32> to vector<32x128xf32>
    %13 = vector.shape_cast %12 : vector<32x128xf32> to vector<4x8x128xf32>
    %14 = vector.extract_strided_slice %11 {offsets = [0, 128], sizes = [32, 128], strides = [1, 1]} : vector<32x384xf32> to vector<32x128xf32>
    %15 = vector.shape_cast %14 : vector<32x128xf32> to vector<4x8x128xf32>
    %16 = vector.extract_strided_slice %11 {offsets = [0, 256], sizes = [32, 128], strides = [1, 1]} : vector<32x384xf32> to vector<32x128xf32>
    %17 = vector.shape_cast %16 : vector<32x128xf32> to vector<4x8x128xf32>
    %cst_7 = arith.constant 1.280000e+02 : f32
    %18 = math.sqrt %cst_7 : f32
    %cst_8 = arith.constant 1.000000e+00 : f32
    %19 = arith.divf %cst_8, %18 : f32
    %c0_9 = arith.constant 0 : index
    %c0_10 = arith.constant 0 : index
    %c0_11 = arith.constant 0 : index
    %20 = vector.load %arg2[%c0_9, %c0_10, %c0_11] : memref<4x1x8xf32, #tpu.memory_space<vmem>>, vector<4x1x8xf32>
    "tpu.trace_start"() <{level = 10 : i32, message = "bqd,bkd->bqk"}> : () -> ()
    %cst_12 = arith.constant dense<0.000000e+00> : vector<4x8x8xf32>
    %21 = tpu.matmul %13, %15, %cst_12 {dimension_numbers = #tpu.dot_dimension_numbers<[2], [2], [1], [1], [0, 0, 0, 1, 1, 1], [0], [0]>} : vector<4x8x128xf32>, vector<4x8x128xf32>, vector<4x8x8xf32> -> vector<4x8x8xf32>
    "tpu.trace_stop"() : () -> ()
    %22 = vector.broadcast %19 : f32 to vector<4x8x8xf32>
    %23 = arith.mulf %21, %22 : vector<4x8x8xf32>
    %cst_13 = arith.constant 1.000000e+00 : f32
    %24 = vector.broadcast %cst_13 : f32 to vector<4x1x8xf32>
    %25 = arith.subf %24, %20 : vector<4x1x8xf32>
    %cst_14 = arith.constant -1.000000e+09 : f32
    %26 = vector.broadcast %cst_14 : f32 to vector<4x1x8xf32>
    %27 = arith.mulf %25, %26 : vector<4x1x8xf32>
    %28 = vector.broadcast %27 : vector<4x1x8xf32> to vector<4x8x8xf32>
    %29 = arith.addf %23, %28 : vector<4x8x8xf32>
    %cst_15 = arith.constant dense<0xFF800000> : vector<4x8xf32>
    %30 = vector.multi_reduction <maximumf>, %29, %cst_15 [2] : vector<4x8x8xf32> to vector<4x8xf32>
    %31 = vector.shape_cast %30 : vector<4x8xf32> to vector<4x8x1xf32>
    %32 = vector.broadcast %31 : vector<4x8x1xf32> to vector<4x8x8xf32>
    %33 = arith.subf %29, %32 : vector<4x8x8xf32>
    %34 = math.exp %33 : vector<4x8x8xf32>
    %cst_16 = arith.constant dense<0.000000e+00> : vector<4x8xf32>
    %35 = vector.multi_reduction <add>, %34, %cst_16 [2] : vector<4x8x8xf32> to vector<4x8xf32>
    %36 = vector.shape_cast %35 : vector<4x8xf32> to vector<4x8x1xf32>
    %37 = vector.broadcast %36 : vector<4x8x1xf32> to vector<4x8x8xf32>
    %38 = arith.divf %34, %37 : vector<4x8x8xf32>
    "tpu.trace_start"() <{level = 10 : i32, message = "bqk,bkd->bqd"}> : () -> ()
    %cst_17 = arith.constant dense<0.000000e+00> : vector<4x8x128xf32>
    %39 = tpu.matmul %38, %17, %cst_17 {dimension_numbers = #tpu.dot_dimension_numbers<[2], [1], [1], [2], [0, 0, 0, 1, 1, 2], [0], [0]>} : vector<4x8x8xf32>, vector<4x8x128xf32>, vector<4x8x128xf32> -> vector<4x8x128xf32>
    "tpu.trace_stop"() : () -> ()
    %40 = vector.shape_cast %39 : vector<4x8x128xf32> to vector<32x128xf32>
    %c0_18 = arith.constant 0 : index
    %c0_19 = arith.constant 0 : index
    %41 = vector.load %arg6[%c0_18, %c0_19] : memref<128x128xf32, #tpu.memory_space<vmem>>, vector<128x128xf32>
    %cst_20 = arith.constant dense<0.000000e+00> : vector<32x128xf32>
    %42 = tpu.matmul %40, %41, %cst_20 {dimension_numbers = #tpu.dot_dimension_numbers<[1], [0], [0], [1], [0, 0, 1, 1], [], []>} : vector<32x128xf32>, vector<128x128xf32>, vector<32x128xf32> -> vector<32x128xf32>
    %43 = vector.shape_cast %42 : vector<32x128xf32> to vector<4x8x128xf32>
    %44 = arith.addf %9, %43 : vector<4x8x128xf32>
    %c0_21 = arith.constant 0 : index
    %c0_22 = arith.constant 0 : index
    %c0_23 = arith.constant 0 : index
    %45 = vector.load %arg3[%c0_21, %c0_22, %c0_23] : memref<4x8x2xf32, #tpu.memory_space<vmem>>, vector<4x8x2xf32>
    %46 = vector.extract_strided_slice %45 {offsets = [0, 0, 0], sizes = [4, 8, 1], strides = [1, 1, 1]} : vector<4x8x2xf32> to vector<4x8x1xf32>
    %47 = vector.extract_strided_slice %45 {offsets = [0, 0, 1], sizes = [4, 8, 1], strides = [1, 1, 1]} : vector<4x8x2xf32> to vector<4x8x1xf32>
    %48 = vector.broadcast %46 : vector<4x8x1xf32> to vector<4x8x128xf32>
    %49 = arith.mulf %44, %48 : vector<4x8x128xf32>
    %cst_24 = arith.constant dense<0.000000e+00> : vector<4x128xf32>
    %50 = vector.multi_reduction <add>, %49, %cst_24 [1] : vector<4x8x128xf32> to vector<4x128xf32>
    %cst_25 = arith.constant dense<0.000000e+00> : vector<4x1xf32>
    %51 = vector.multi_reduction <add>, %46, %cst_25 [1] : vector<4x8x1xf32> to vector<4x1xf32>
    %52 = vector.broadcast %51 : vector<4x1xf32> to vector<4x128xf32>
    %53 = arith.divf %50, %52 : vector<4x128xf32>
    %54 = vector.broadcast %47 : vector<4x8x1xf32> to vector<4x8x128xf32>
    %55 = arith.mulf %44, %54 : vector<4x8x128xf32>
    %cst_26 = arith.constant dense<0.000000e+00> : vector<4x128xf32>
    %56 = vector.multi_reduction <add>, %55, %cst_26 [1] : vector<4x8x128xf32> to vector<4x128xf32>
    %cst_27 = arith.constant dense<0.000000e+00> : vector<4x1xf32>
    %57 = vector.multi_reduction <add>, %47, %cst_27 [1] : vector<4x8x1xf32> to vector<4x1xf32>
    %58 = vector.broadcast %57 : vector<4x1xf32> to vector<4x128xf32>
    %59 = arith.divf %56, %58 : vector<4x128xf32>
    %60 = tpu.concatenate %53, %59 in 1 : vector<4x128xf32>, vector<4x128xf32> -> vector<4x256xf32>
    %c0_28 = arith.constant 0 : index
    %c0_29 = arith.constant 0 : index
    %61 = vector.load %arg7[%c0_28, %c0_29] : memref<256x128xf32, #tpu.memory_space<vmem>>, vector<256x128xf32>
    %cst_30 = arith.constant dense<0.000000e+00> : vector<4x128xf32>
    %62 = tpu.matmul %60, %61, %cst_30 {dimension_numbers = #tpu.dot_dimension_numbers<[1], [0], [0], [1], [0, 0, 1, 1], [], []>} : vector<4x256xf32>, vector<256x128xf32>, vector<4x128xf32> -> vector<4x128xf32>
    %63 = vector.shape_cast %62 : vector<4x128xf32> to vector<4x1x128xf32>
    %c0_31 = arith.constant 0 : index
    %c0_32 = arith.constant 0 : index
    %c0_33 = arith.constant 0 : index
    %64 = vector.load %arg8[%c0_31, %c0_32, %c0_33] : memref<4x1x128xf32, #tpu.memory_space<vmem>>, vector<4x1x128xf32>
    tpu.vector_store %arg8[%c0_31, %c0_32, %c0_33], %63 {strides = array<i32>} : memref<4x1x128xf32, #tpu.memory_space<vmem>>, vector<4x1x128xf32>,
    return
  }
  func.func @transform_0(%arg0: i32) -> (i32, i32, i32) {
    %c0_i32 = arith.constant 0 : i32
    %c0_i32_0 = arith.constant 0 : i32
    %c0_i32_1 = arith.constant 0 : i32
    return %arg0, %c0_i32, %c0_i32_0 : i32, i32, i32
  }
  func.func @transform_1(%arg0: i32) -> (i32, i32, i32) {
    %c0_i32 = arith.constant 0 : i32
    %c0_i32_0 = arith.constant 0 : i32
    %c0_i32_1 = arith.constant 0 : i32
    return %arg0, %c0_i32, %c0_i32_0 : i32, i32, i32
  }
  func.func @transform_2(%arg0: i32) -> (i32, i32, i32) {
    %c0_i32 = arith.constant 0 : i32
    %c0_i32_0 = arith.constant 0 : i32
    %c0_i32_1 = arith.constant 0 : i32
    return %arg0, %c0_i32, %c0_i32_0 : i32, i32, i32
  }
  func.func @transform_3(%arg0: i32) -> (i32, i32) {
    %c0_i32 = arith.constant 0 : i32
    %c0_i32_0 = arith.constant 0 : i32
    %c0_i32_1 = arith.constant 0 : i32
    return %c0_i32, %c0_i32_0 : i32, i32
  }
  func.func @transform_4(%arg0: i32) -> (i32, i32) {
    %c0_i32 = arith.constant 0 : i32
    %c0_i32_0 = arith.constant 0 : i32
    %c0_i32_1 = arith.constant 0 : i32
    return %c0_i32, %c0_i32_0 : i32, i32
  }
  func.func @transform_5(%arg0: i32) -> (i32, i32) {
    %c0_i32 = arith.constant 0 : i32
    %c0_i32_0 = arith.constant 0 : i32
    %c0_i32_1 = arith.constant 0 : i32
    return %c0_i32, %c0_i32_0 : i32, i32
  }
  func.func @transform_6(%arg0: i32) -> (i32, i32) {
    %c0_i32 = arith.constant 0 : i32
    %c0_i32_0 = arith.constant 0 : i32
    %c0_i32_1 = arith.constant 0 : i32
    return %c0_i32, %c0_i32_0 : i32, i32
  }
  func.func @transform_7(%arg0: i32) -> (i32, i32, i32) {
    %c0_i32 = arith.constant 0 : i32
    %c0_i32_0 = arith.constant 0 : i32
    %c0_i32_1 = arith.constant 0 : i32
    return %arg0, %c0_i32, %c0_i32_0 : i32, i32, i32
  }
}

</mosaic_0001>

<bundles_post_ra>
// kernel: tpu_custom_call.1
= control target key start
LH: loop header
LB: loop body
LE: loop exit
PB: predicated region body
PF: predicated region fallthrough
CT: control target
= control target key end

     0   :  { %12 = vsyncpa [#allocation3], 0  ;;  %s2238_s0 = inlined_call_operand.vmem [shape: s32[4,8,1], index: 0, kind: input, shape index: {}]   ;;  %s2239_s1 = inlined_call_operand.vmem [shape: f32[4,1,8], index: 1, kind: input, shape index: {}]   ;;  %s2240_s2 = inlined_call_operand.vmem [shape: f32[4,8,2], index: 2, kind: input, shape index: {}]   ;;  %s2241_s3 = inlined_call_operand.hbm [shape: f32[128,128], index: 3, kind: input, shape index: {}]   ;;  %s2242_s4 = inlined_call_operand.hbm [shape: f32[128,384], index: 4, kind: input, shape index: {}]   ;;  %s2243_s5 = inlined_call_operand.hbm [shape: f32[128,128], index: 5, kind: input, shape index: {}]   ;;  %s2244_s6 = inlined_call_operand.hbm [shape: f32[256,128], index: 6, kind: input, shape index: {}]   ;;  %s2245_s7 = inlined_call_operand.hbm [shape: f32[4,1,128], index: 7, kind: output, shape index: {}]  }
   0x1   :  { %13 = vsyncpa [#allocation6], 0 }
   0x2   :  { %14 = vsyncpa [#allocation9], 0 }
   0x3   :  { %15 = vsyncpa [#allocation4], 0  ;;  %s2029_s24 = smov [#allocation5]  }
   0x4   :  { %s39_s25 = sshll.u32 %s2029_s24, 4  ;;  %s40_s25 = int_to_ptr.vmem [resolvable:$true] %s39_s25 }
   0x5   :  { %s1929_s26 = scalar_lea.vmem %s40_s25, 6144  ;;  %p1934_p1 = scmp.lt.s32.totalorder %s40_s25, %s40_s25 }
   0x6   :  { %p1930_p0 = scmp.ne.s32.totalorder %s40_s25, %s1929_s26  ;;  %p1935_p2 = scmp.lt.s32.totalorder %s1929_s26, %s1929_s26 }
   0x8   :  { %p1936_p3 = por %p1935_p2, %p1934_p1 }
   0xa   :  { %p1937_p4 = pnand %p1936_p3, %p1930_p0 }
   0xc   :  { %1940 = shalt.err (!%p1937_p4)
}
   0xd   :  { %s2030_s27 = smov 384   ;;  %s2031_s28 = smov 24  }
   0xe   :  { %45 = dma.hbm_to_vmem [thread:$0]  %s2242_s4, 6144, %s40_s25, [#allocation6], %s2030_s27, %s2030_s27, %s2031_s28  }
   0xf   :  { %s2032_s8 = smov [#allocation2]  }
  0x10   :  { %s27_s9 = sshll.u32 %s2032_s8, 4  ;;  %s28_s9 = int_to_ptr.vmem [resolvable:$true] %s27_s9 }
  0x11   :  { %s1949_s10 = scalar_lea.vmem %s28_s9, 2048  ;;  %p1954_p6 = scmp.lt.s32.totalorder %s28_s9, %s28_s9 }
  0x12   :  { %p1950_p5 = scmp.ne.s32.totalorder %s28_s9, %s1949_s10  ;;  %p1955_p7 = scmp.lt.s32.totalorder %s1949_s10, %s1949_s10 }
  0x14   :  { %p1956_p8 = por %p1955_p7, %p1954_p6 }
  0x16   :  { %p1957_p9 = pnand %p1956_p8, %p1950_p5 }
  0x18   :  { %1960 = shalt.err (!%p1957_p9)
}
  0x19   :  { %s2033_s11 = smov 128   ;;  %s2034_s12 = smov 8  }
  0x1a   :  { %33 = dma.hbm_to_vmem [thread:$0]  %s2241_s3, 2048, %s28_s9, [#allocation3], %s2033_s11, %s2033_s11, %s2034_s12  }
  0x1b   :  { %s2035_s15 = smov [#allocation7]   ;;  %s2036_s17 = smov [#allocation8]  }
  0x1c   :  { %s51_s16 = sshll.u32 %s2035_s15, 4  ;;  %s63_s4 = sshll.u32 %s2036_s17, 4  ;;  %s52_s16 = int_to_ptr.vmem [resolvable:$true] %s51_s16  ;;  %s64_s4 = int_to_ptr.vmem [resolvable:$true] %s63_s4 }
  0x1d   :  { %s1969_s18 = scalar_lea.vmem %s52_s16, 2048  ;;  %p1974_p11 = scmp.lt.s32.totalorder %s52_s16, %s52_s16 }
  0x1e   :  { %p1970_p10 = scmp.ne.s32.totalorder %s52_s16, %s1969_s18  ;;  %p1975_p12 = scmp.lt.s32.totalorder %s1969_s18, %s1969_s18 }
  0x20   :  { %p1976_p13 = por %p1975_p12, %p1974_p11 }
  0x22   :  { %p1977_p0 = pnand %p1976_p13, %p1970_p10 }
  0x24   :  { %1980 = shalt.err (!%p1977_p0)
}
  0x25   :  { %57 = dma.hbm_to_vmem [thread:$0]  %s2243_s5, 2048, %s52_s16, [#allocation6], %s2033_s11, %s2033_s11, %s2034_s12  }
  0x26   :  { %s1989_s21 = scalar_lea.vmem %s64_s4, 4096  ;;  %p1994_p2 = scmp.lt.s32.totalorder %s64_s4, %s64_s4 }
  0x27   :  { %p1990_p1 = scmp.ne.s32.totalorder %s64_s4, %s1989_s21  ;;  %p1995_p3 = scmp.lt.s32.totalorder %s1989_s21, %s1989_s21 }
  0x29   :  { %p1996_p4 = por %p1995_p3, %p1994_p2 }
  0x2b   :  { %p1997_p5 = pnand %p1996_p4, %p1990_p1 }
  0x2d   :  { %2000 = shalt.err (!%p1997_p5)
}
  0x2e   :  { %69 = dma.hbm_to_vmem [thread:$0]  %s2244_s6, 4096, %s64_s4, [#allocation9], %s2033_s11, %s2033_s11, %s2034_s12  }
  0x2f   :  { %2021 = dma.done.wait [#allocation3], 2048  }
  0x30   :  { %2022 = vsyncadd [#allocation3], 4294965248 }
  0x31   :  { %2023 = dma.done.wait [#allocation6], 8192  }
  0x32   :  { %2024 = vsyncadd [#allocation6], 4294959104 }
  0x33   :  { %2025 = dma.done.wait [#allocation9], 4096  }
  0x34   :  { %2026 = vsyncadd [#allocation9], 4294963200  ;;  %v2037_v0 = vmov 0   ;;  %v82_v1 = vld [vmem:[%s2238_s0] sm:$0xff]  ;;  %v84_v2 = vld [vmem:[%s2238_s0 + $0x10] sm:$0xff]  ;;  %v86_v51 = vlaneseq  ;;  %v2038_v55 = vmov 1.0  }
  0x35   :  { %1880 = vset.pattern.permute.xlu0 %v2037_v0  ;;  %1881 = vset.pattern.permute.xlu1 %v2037_v0  ;;  %v127_v3 = vld [vmem:[#allocation2 + $0x78] sm:$0xff]  ;;  %v126_v4 = vld [vmem:[#allocation2 + $0x70] sm:$0xff]  ;;  %v83_v5 = vld [vmem:[%s2238_s0 + $0x8] sm:$0xff]  ;;  %vm2040_vm4 = vmmov 0   ;;  %vm759_vm5 = vcmask 64512   ;;  %vm1354_vm6 = vcmask 15368  }
  0x36   :  { %89 = vperm.xlu0 %1880, %v82_v1   ;;  %95 = vperm.xlu1 %1881, %v84_v2   ;;  %v85_v6 = vld [vmem:[%s2238_s0 + $0x18] sm:$0xff]  ;;  %v125_v7 = vld [vmem:[#allocation2 + $0x68] sm:$0xff]  ;;  %v124_v8 = vld [vmem:[#allocation2 + $0x60] sm:$0xff]  ;;  %v87_v52 = vand.u32 127, %v86_v51  ;;  %vm1253_vm7 = vcmask 7168   ;;  %vm1415_vm8 = vcmask 1041409  }
  0x37   :  { %1709 = vmatprep.subr.mxu0 %v127_v3  ;;  %v259_v9 = vld [vmem:[#allocation5 + $0x170] sm:$0xff]  ;;  %v258_v10 = vld [vmem:[#allocation5 + $0x168] sm:$0xff]  ;;  %v256_v11 = vld [vmem:[#allocation5 + $0x158] sm:$0xff]  ;;  %vm1417_vm9 = vcmask 1042434   ;;  %vm1419_vm10 = vcmask 1043459  }
  0x38   :  { %1710 = vmatpush3.msra.mxu0 %v127_v3  ;;  %261 = vmatprep.subr.mxu1 %v259_v9  ;;  %v123_v12 = vld [vmem:[#allocation2 + $0x58] sm:$0xff]  ;;  %v255_v13 = vld [vmem:[#allocation5 + $0x150] sm:$0xff]  ;;  %v253_v14 = vld [vmem:[#allocation5 + $0x140] sm:$0xff] }
  0x39   :  { %1711 = vmatprep.subr.mxu0 %v126_v4  ;;  %262 = vmatpush1.msra.mxu1 %v258_v10  ;;  %v252_v15 = vld [vmem:[#allocation5 + $0x138] sm:$0xff]  ;;  %v122_v16 = vld [vmem:[#allocation2 + $0x50] sm:$0xff]  ;;  %v250_v17 = vld [vmem:[#allocation5 + $0x128] sm:$0xff] }
  0x3a   :  { %92 = vperm.xlu0 %1880, %v83_v5   ;;  %98 = vperm.xlu1 %1881, %v85_v6   ;;  %v249_v18 = vld [vmem:[#allocation5 + $0x120] sm:$0xff]  ;;  %v121_v19 = vld [vmem:[#allocation2 + $0x48] sm:$0xff]  ;;  %v247_v20 = vld [vmem:[#allocation5 + $0x110] sm:$0xff] }
  0x3b   :  { %1712 = vmatpush3.msra.mxu0 %v126_v4  ;;  %263 = vmatprep.subr.mxu1 %v256_v11  ;;  %v246_v21 = vld [vmem:[#allocation5 + $0x108] sm:$0xff]  ;;  %v120_v22 = vld [vmem:[#allocation2 + $0x40] sm:$0xff]  ;;  %v244_v23 = vld [vmem:[#allocation5 + $0xf8] sm:$0xff] }
  0x3c   :  { %1713 = vmatprep.subr.mxu0 %v125_v7  ;;  %264 = vmatpush1.msra.mxu1 %v255_v13  ;;  %v243_v24 = vld [vmem:[#allocation5 + $0xf0] sm:$0xff]  ;;  %v119_v25 = vld [vmem:[#allocation2 + $0x38] sm:$0xff]  ;;  %v241_v26 = vld [vmem:[#allocation5 + $0xe0] sm:$0xff]  ;;  %v2039_v13 = vmov 0.0  }
  0x3d   :  { %1714 = vmatpush3.msra.mxu0 %v125_v7  ;;  %265 = vmatprep.subr.mxu1 %v253_v14  ;;  %v240_v27 = vld [vmem:[#allocation5 + $0xd8] sm:$0xff]  ;;  %v118_v28 = vld [vmem:[#allocation2 + $0x30] sm:$0xff]  ;;  %v238_v29 = vld [vmem:[#allocation5 + $0xc8] sm:$0xff] }
  0x3e   :  { %1715 = vmatprep.subr.mxu0 %v124_v8  ;;  %266 = vmatpush1.msra.mxu1 %v252_v15  ;;  %v237_v30 = vld [vmem:[#allocation5 + $0xc0] sm:$0xff]  ;;  %v117_v31 = vld [vmem:[#allocation2 + $0x28] sm:$0xff]  ;;  %v235_v32 = vld [vmem:[#allocation5 + $0xb0] sm:$0xff] }
  0x3f   :  { %1716 = vmatpush3.msra.mxu0 %v124_v8  ;;  %267 = vmatprep.subr.mxu1 %v250_v17  ;;  %v234_v33 = vld [vmem:[#allocation5 + $0xa8] sm:$0xff]  ;;  %v116_v34 = vld [vmem:[#allocation2 + $0x20] sm:$0xff]  ;;  %v232_v35 = vld [vmem:[#allocation5 + $0x98] sm:$0xff] }
  0x40   :  { %1717 = vmatprep.subr.mxu0 %v123_v12  ;;  %268 = vmatpush1.msra.mxu1 %v249_v18  ;;  %v231_v36 = vld [vmem:[#allocation5 + $0x90] sm:$0xff]  ;;  %v115_v37 = vld [vmem:[#allocation2 + $0x18] sm:$0xff]  ;;  %v229_v38 = vld [vmem:[#allocation5 + $0x80] sm:$0xff] }
  0x41   :  { %1718 = vmatpush3.msra.mxu0 %v123_v12  ;;  %269 = vmatprep.subr.mxu1 %v247_v20  ;;  %v228_v39 = vld [vmem:[#allocation5 + $0x78] sm:$0xff]  ;;  %v114_v40 = vld [vmem:[#allocation2 + $0x10] sm:$0xff]  ;;  %v226_v41 = vld [vmem:[#allocation5 + $0x68] sm:$0xff] }
  0x42   :  { %1719 = vmatprep.subr.mxu0 %v122_v16  ;;  %270 = vmatpush1.msra.mxu1 %v246_v21  ;;  %v225_v42 = vld [vmem:[#allocation5 + $0x60] sm:$0xff]  ;;  %v113_v43 = vld [vmem:[#allocation2 + $0x8] sm:$0xff]  ;;  %v223_v44 = vld [vmem:[#allocation5 + $0x50] sm:$0xff] }
  0x43   :  { %1720 = vmatpush3.msra.mxu0 %v122_v16  ;;  %271 = vmatprep.subr.mxu1 %v244_v23  ;;  %v222_v45 = vld [vmem:[#allocation5 + $0x48] sm:$0xff]  ;;  %v112_v46 = vld [vmem:[#allocation2] sm:$0xff]  ;;  %v220_v47 = vld [vmem:[#allocation5 + $0x38] sm:$0xff] }
  0x44   :  { %1721 = vmatprep.subr.mxu0 %v121_v19  ;;  %272 = vmatpush1.msra.mxu1 %v243_v24  ;;  %v219_v48 = vld [vmem:[#allocation5 + $0x30] sm:$0xff]  ;;  %v260_v49 = vld [vmem:[#allocation5 + $0x178] sm:$0xff]  ;;  %v217_v50 = vld [vmem:[#allocation5 + $0x20] sm:$0xff] }
  0x45   :  { %1722 = vmatpush3.msra.mxu0 %v121_v19  ;;  %273 = vmatprep.subr.mxu1 %v241_v26  ;;  %v257_v58 = vld [vmem:[#allocation5 + $0x160] sm:$0xff]  ;;  %v254_v59 = vld [vmem:[#allocation5 + $0x148] sm:$0xff]  ;;  %v251_v60 = vld [vmem:[#allocation5 + $0x130] sm:$0xff] }
  0x46   :  { %1723 = vmatprep.subr.mxu0 %v120_v22  ;;  %274 = vmatpush1.msra.mxu1 %v240_v27  ;;  %v248_v61 = vld [vmem:[#allocation5 + $0x118] sm:$0xff]  ;;  %v245_v62 = vld [vmem:[#allocation5 + $0x100] sm:$0xff]  ;;  %v242_v63 = vld [vmem:[#allocation5 + $0xe8] sm:$0xff] }
  0x47   :  { %1724 = vmatpush3.msra.mxu0 %v120_v22  ;;  %275 = vmatprep.subr.mxu1 %v238_v29  ;;  %v239_v1 = vld [vmem:[#allocation5 + $0xd0] sm:$0xff]  ;;  %v236_v2 = vld [vmem:[#allocation5 + $0xb8] sm:$0xff]  ;;  %v233_v3 = vld [vmem:[#allocation5 + $0xa0] sm:$0xff] }
  0x48   :  { %1725 = vmatprep.subr.mxu0 %v119_v25  ;;  %276 = vmatpush1.msra.mxu1 %v237_v30  ;;  %v230_v4 = vld [vmem:[#allocation5 + $0x88] sm:$0xff]  ;;  %v227_v5 = vld [vmem:[#allocation5 + $0x70] sm:$0xff]  ;;  %v224_v6 = vld [vmem:[#allocation5 + $0x58] sm:$0xff] }
  0x49   :  { %1726 = vmatpush3.msra.mxu0 %v119_v25  ;;  %277 = vmatprep.subr.mxu1 %v235_v32  ;;  %v221_v7 = vld [vmem:[#allocation5 + $0x40] sm:$0xff]  ;;  %v216_v8 = vld [vmem:[#allocation5 + $0x18] sm:$0xff]  ;;  %v218_v9 = vld [vmem:[#allocation5 + $0x28] sm:$0xff] }
  0x4a   :  { %1727 = vmatprep.subr.mxu0 %v118_v28  ;;  %278 = vmatpush1.msra.mxu1 %v234_v33  ;;  %v214_v10 = vld [vmem:[#allocation5 + $0x8] sm:$0xff]  ;;  %v213_v11 = vld [vmem:[#allocation5] sm:$0xff]  ;;  %v215_v12 = vld [vmem:[#allocation5 + $0x10] sm:$0xff] }
  0x4b   :  { %1728 = vmatpush3.msra.mxu0 %v118_v28  ;;  %279 = vmatprep.subr.mxu1 %v232_v35  ;;  %v435_v30 = vld [vmem:[%s2239_s1] sm:$0x1]  ;;  %v436_v33 = vld [vmem:[%s2239_s1 + $0x1] sm:$0x1] }
  0x4c   :  { %1729 = vmatprep.subr.mxu0 %v117_v31  ;;  %280 = vmatpush1.msra.mxu1 %v231_v36  ;;  %v723_v32 = vsub.f32 1.0, %v435_v30  ;;  %v724_v36 = vsub.f32 1.0, %v436_v33  ;;  %v2183_v33 = vld [vmem:[%s2240_s2 + $0x10] sm:$0xff] }
  0x4d   :  { %1730 = vmatpush3.msra.mxu0 %v117_v31  ;;  %281 = vmatprep.subr.mxu1 %v229_v38  ;;  %v2160_v31 = vshrl.u32 %v86_v51, 7 }
  0x4e   :  { %1731 = vmatprep.subr.mxu0 %v116_v34  ;;  %282 = vmatpush1.msra.mxu1 %v228_v39  ;;  %v728_v39 = vmul.f32 -1e+09, %v724_v36 }
  0x4f   :  { %1732 = vmatpush3.msra.mxu0 %v116_v34  ;;  %283 = vmatprep.subr.mxu1 %v226_v41  ;;  %v727_v34 = vmul.f32 -1e+09, %v723_v32  ;;  %v737_v35 = vsub.s32 0, %v2160_v31 }
  0x50   :  { %1733 = vmatprep.subr.mxu0 %v115_v37  ;;  %284 = vmatpush1.msra.mxu1 %v225_v42  ;;  %v438_v42 = vld [vmem:[%s2239_s1 + $0x3] sm:$0x1] }
  0x51   :  { %1734 = vmatpush3.msra.mxu0 %v115_v37  ;;  %285 = vmatprep.subr.mxu1 %v223_v44  ;;  %v437_v37 = vld [vmem:[%s2239_s1 + $0x2] sm:$0x1]  ;;  %v738_v38 = vrot.slane %v727_v34, %v737_v35  ;;  %v1111_v34 = vld [vmem:[#allocation7 + $0x78] sm:$0xff] }
  0x52   :  { %1735 = vmatprep.subr.mxu0 %v114_v40  ;;  %286 = vmatpush1.msra.mxu1 %v222_v45 }
  0x53   :  { %1736 = vmatpush3.msra.mxu0 %v114_v40  ;;  %287 = vmatprep.subr.mxu1 %v220_v47  ;;  %v725_v40 = vsub.f32 1.0, %v437_v37 }
  0x54   :  { %1737 = vmatprep.subr.mxu0 %v113_v43  ;;  %288 = vmatpush1.msra.mxu1 %v219_v48  ;;  %v726_v48 = vsub.f32 1.0, %v438_v42 }
  0x55   :  { %1738 = vmatpush3.msra.mxu0 %v113_v43  ;;  %289 = vmatprep.subr.mxu1 %v217_v50  ;;  %v729_v47 = vmul.f32 -1e+09, %v725_v40 }
  0x56   :  { %1739 = vmatprep.subr.mxu0 %v112_v46  ;;  %290 = vmatpush1.msra.mxu1 %v216_v8 }
  0x57   :  { %1740 = vmatpush3.msra.mxu0 %v112_v46  ;;  %291 = vmatprep.subr.mxu1 %v214_v10  ;;  %v742_v46 = vrot.slane %v728_v39, %v737_v35 }
  0x58   :  { %1747 = vmatprep.subr.mxu0 %v260_v49  ;;  %292 = vmatpush1.msra.mxu1 %v213_v11 }
  0x59   :  { %325 = vmatprep.mubr.f32.mxu1 %v2039_v13  ;;  %1785 = vmatprep.subr.mxu1 %v2039_v13 }
  0xb1   :  { %v90_v53 = vpop.permute.xlu0 %89  ;;  %v96_v54 = vpop.permute.xlu1 %95 }
  0xb2   :  { %vm100_vm0 = vcmp.eq.s32.totalorder %v87_v52, %v90_v53  ;;  %vm102_vm1 = vcmp.eq.s32.totalorder %v87_v52, %v96_v54  ;;  %v746_v54 = vrot.slane %v729_v47, %v737_v35 }
  0xb3   :  { %1741 = vmatprep.mubr.msk.f32.mxu0 %vm100_vm0, %v2038_v55 }
  0xb5   :  { %v93_v56 = vpop.permute.xlu0 %92  ;;  %v99_v57 = vpop.permute.xlu1 %98 }
  0xb6   :  { %vm101_vm2 = vcmp.eq.s32.totalorder %v87_v52, %v93_v56  ;;  %vm103_vm3 = vcmp.eq.s32.totalorder %v87_v52, %v99_v57 }
  0xb7   :  { %1742 = vmatmul.mubr.msk.f32.vlgmr.msra.gmra.mxu0 %vm101_vm2, %v2038_v55 }
  0xb8   :  { %1744 = vmatprep.mubr.msk.f32.mxu0 %vm102_vm1, %v2038_v55  ;;  %1748 = vmatpush3.msra.mxu0 %v260_v49 }
  0xb9   :  { %1749 = vmatprep.subr.mxu0 %v257_v58 }
  0xba   :  { %1750 = vmatpush3.msra.mxu0 %v257_v58 }
  0xbb   :  { %1745 = vmatmul.mubr.msk.f32.gmra.mxu0 %vm103_vm3, %v2038_v55  ;;  %1751 = vmatprep.subr.mxu0 %v254_v59  ;;  %v730_v55 = vmul.f32 -1e+09, %v726_v48  ;;  %v1108_v48 = vld [vmem:[#allocation7 + $0x60] sm:$0xff] }
  0xbc   :  { %1752 = vmatpush3.msra.mxu0 %v254_v59 }
  0xbd   :  { %1753 = vmatprep.subr.mxu0 %v251_v60 }
  0xbe   :  { %1754 = vmatpush3.msra.mxu0 %v251_v60 }
  0xbf   :  { %1755 = vmatprep.subr.mxu0 %v248_v61 }
  0xc0   :  { %1756 = vmatpush3.msra.mxu0 %v248_v61  ;;  %v750_v61 = vrot.slane %v730_v55, %v737_v35  ;;  %v1099_v55 = vld [vmem:[#allocation7 + $0x18] sm:$0xff] }
  0xc1   :  { %1757 = vmatprep.subr.mxu0 %v245_v62 }
  0xc2   :  { %1758 = vmatpush3.msra.mxu0 %v245_v62 }
  0xc3   :  { %1759 = vmatprep.subr.mxu0 %v242_v63 }
  0xc4   :  { %1760 = vmatpush3.msra.mxu0 %v242_v63 }
  0xc5   :  { %1761 = vmatprep.subr.mxu0 %v239_v1 }
  0xc6   :  { %1762 = vmatpush3.msra.mxu0 %v239_v1 }
  0xc7   :  { %1763 = vmatprep.subr.mxu0 %v236_v2 }
  0xc8   :  { %1764 = vmatpush3.msra.mxu0 %v236_v2 }
  0xc9   :  { %1765 = vmatprep.subr.mxu0 %v233_v3 }
  0xca   :  { %1766 = vmatpush3.msra.mxu0 %v233_v3 }
  0xcb   :  { %1767 = vmatprep.subr.mxu0 %v230_v4 }
  0xcc   :  { %1768 = vmatpush3.msra.mxu0 %v230_v4 }
  0xcd   :  { %1769 = vmatprep.subr.mxu0 %v227_v5 }
  0xce   :  { %1770 = vmatpush3.msra.mxu0 %v227_v5 }
  0xcf   :  { %1771 = vmatprep.subr.mxu0 %v224_v6 }
  0xd0   :  { %1772 = vmatpush3.msra.mxu0 %v224_v6 }
  0xd1   :  { %1773 = vmatprep.subr.mxu0 %v221_v7 }
  0xd2   :  { %1774 = vmatpush3.msra.mxu0 %v221_v7 }
  0xd3   :  { %1775 = vmatprep.subr.mxu0 %v218_v9 }
  0xd4   :  { %1776 = vmatpush3.msra.mxu0 %v218_v9 }
  0xd5   :  { %1777 = vmatprep.subr.mxu0 %v215_v12 }
  0xd6   :  { %1778 = vmatpush3.msra.mxu0 %v215_v12 }
  0xd7   :  { %1815 = vmatprep.subr.mxu0 %v2039_v13 }
 0x177   :  { %v2116_v14 = vpop.f32.mrf.mxu0 }
 0x179   :  { %v2118_v15 = vpop.f32.mrf.mxu0 }
 0x17a   :  { %326 = vmatmul.mubr.f32.vlgmr.msra.gmra.mxu1 %v2118_v15  ;;  %1779 = vmatprep.mubr.f32.mxu0 %v2118_v15 }
 0x17b   :  { %1780 = vmatmul.mubr.f32.vlgmr.msra.gmra.mxu0 %v2116_v14  ;;  %331 = vmatprep.mubr.f32.mxu1 %v2039_v13  ;;  %v2124_v16 = vpop.f32.mrf.mxu0 }
 0x17d   :  { %v2126_v17 = vpop.f32.mrf.mxu0 }
 0x17e   :  { %332 = vmatmul.mubr.f32.gmra.mxu1 %v2116_v14  ;;  %1782 = vmatprep.mubr.f32.mxu0 %v2126_v17 }
 0x17f   :  { %337 = vmatprep.mubr.f32.mxu1 %v2039_v13  ;;  %1783 = vmatmul.mubr.f32.gmra.mxu0 %v2124_v16 }
 0x180   :  { %1817 = vmatprep.mubr.msk.f32.mxu0 %vm2040_vm4, %v2039_v13 }
 0x182   :  { %338 = vmatmul.mubr.f32.gmra.mxu1 %v2126_v17 }
 0x183   :  { %343 = vmatprep.mubr.f32.mxu1 %v2039_v13 }
 0x186   :  { %344 = vmatmul.mubr.f32.gmra.mxu1 %v2124_v16 }
 0x187   :  { %1787 = vmatprep.mubr.msk.f32.mxu1 %vm2040_vm4, %v2039_v13 }
 0x23a   :  { %v327_v18 = vpop.f32.mrf.mxu1 }
 0x23b   :  { %v2139_v19 = vpop.f32.mrf.mxu0 }
 0x23c   :  { %v329_v20 = vpop.f32.mrf.mxu1 }
 0x23d   :  { %v416_v21 = vpop.f32.mrf.mxu0  ;;  %1786 = vmatpush3.xpose.msra.mxu1 %v329_v20 }
 0x23e   :  { %v333_v22 = vpop.f32.mrf.mxu1  ;;  %1790 = vmatprep.subr.mxu1 %v2039_v13 }
 0x23f   :  { %v2142_v23 = vpop.f32.mrf.mxu0 }
 0x240   :  { %v335_v24 = vpop.f32.mrf.mxu1  ;;  %1788 = vmatmul.mubr.f32.vlgmr.msra.gmra.mxu1 %v327_v18 }
 0x241   :  { %1791 = vmatpush3.xpose.msra.mxu1 %v335_v24  ;;  %1792 = vmatprep.mubr.msk.f32.mxu1 %vm2040_vm4, %v2039_v13  ;;  %v426_v25 = vpop.f32.mrf.mxu0 }
 0x242   :  { %v339_v26 = vpop.f32.mrf.mxu1  ;;  %1795 = vmatprep.subr.mxu1 %v2039_v13  ;;  %1816 = vmatpush3.msra.mxu0 %v426_v25 }
 0x243   :  { %1825 = vmatprep.subr.mxu0 %v1111_v34 }
 0x244   :  { %v341_v27 = vpop.f32.mrf.mxu1  ;;  %1793 = vmatmul.mubr.f32.vlgmr.msra.gmra.mxu1 %v333_v22 }
 0x245   :  { %1796 = vmatpush3.xpose.msra.mxu1 %v341_v27  ;;  %1797 = vmatprep.mubr.msk.f32.mxu1 %vm2040_vm4, %v2039_v13 }
 0x246   :  { %v345_v28 = vpop.f32.mrf.mxu1  ;;  %1800 = vmatprep.subr.mxu1 %v2039_v13 }
 0x248   :  { %v347_v29 = vpop.f32.mrf.mxu1  ;;  %1798 = vmatmul.mubr.f32.vlgmr.msra.gmra.mxu1 %v339_v26 }
 0x249   :  { %1801 = vmatpush3.xpose.msra.mxu1 %v347_v29  ;;  %1802 = vmatprep.mubr.msk.f32.mxu1 %vm2040_vm4, %v2039_v13 }
 0x24a   :  { %1805 = vmatprep.subr.mxu1 %v2039_v13 }
 0x24c   :  { %1803 = vmatmul.mubr.f32.vlgmr.msra.gmra.mxu1 %v345_v28 }
 0x24d   :  { %1806 = vmatpush3.msra.mxu1 %v416_v21  ;;  %1807 = vmatprep.mubr.msk.f32.mxu1 %vm2040_vm4, %v2039_v13 }
 0x24e   :  { %1810 = vmatprep.subr.mxu1 %v2039_v13 }
 0x300   :  { %v505_v41 = vpop.f32.mrf.mxu1 }
 0x301   :  { %v719_v43 = vmul.f32 0.088388346, %v505_v41 }
 0x302   :  { %v1789_v44 = vpop.f32.mrf.mxu1 }
 0x303   :  { %v755_v45 = vadd.f32 %v738_v38, %v719_v43 }
 0x304   :  { %v575_v49 = vpop.f32.mrf.mxu1 }
 0x305   :  { %v720_v50 = vmul.f32 0.088388346, %v575_v49  ;;  %v760_v51 = vsel %vm759_vm5, %v755_v45, -inf  ;;  %v1107_v49 = vld [vmem:[#allocation7 + $0x58] sm:$0xff] }
 0x306   :  { %761 = vmax.xlane.f32.xlu0 %v760_v51  ;;  %v1794_v52 = vpop.f32.mrf.mxu1  ;;  %v1103_v51 = vld [vmem:[#allocation7 + $0x38] sm:$0xff] }
 0x307   :  { %v756_v53 = vadd.f32 %v742_v46, %v720_v50  ;;  %v1104_v50 = vld [vmem:[#allocation7 + $0x40] sm:$0xff]  ;;  %v1102_v52 = vld [vmem:[#allocation7 + $0x30] sm:$0xff] }
 0x308   :  { %v645_v56 = vpop.f32.mrf.mxu1 }
 0x309   :  { %v721_v57 = vmul.f32 0.088388346, %v645_v56  ;;  %v763_v58 = vsel %vm759_vm5, %v756_v53, -inf  ;;  %v1098_v56 = vld [vmem:[#allocation7 + $0x10] sm:$0xff] }
 0x30a   :  { %764 = vmax.xlane.f32.xlu1 %v763_v58  ;;  %v1799_v59 = vpop.f32.mrf.mxu1  ;;  %v1096_v58 = vld [vmem:[#allocation7] sm:$0xff] }
 0x30b   :  { %v757_v60 = vadd.f32 %v746_v54, %v721_v57  ;;  %v1100_v54 = vld [vmem:[#allocation7 + $0x20] sm:$0xff]  ;;  %v1097_v57 = vld [vmem:[#allocation7 + $0x8] sm:$0xff] }
 0x30c   :  { %v715_v62 = vpop.f32.mrf.mxu1  ;;  %v1201_v59 = vld [vmem:[%s2240_s2] sm:$0xff] }
 0x30d   :  { %v722_v63 = vmul.f32 0.088388346, %v715_v62  ;;  %v766_v1 = vsel %vm759_vm5, %v757_v60, -inf  ;;  %v2041_v62 = vmov 1  }
 0x30e   :  { %767 = vmax.xlane.f32.xlu0 %v766_v1  ;;  %v1804_v2 = vpop.f32.mrf.mxu1  ;;  %1882 = vset.pattern.permute.xlu1 %v2041_v62 }
 0x30f   :  { %v758_v3 = vadd.f32 %v750_v61, %v722_v63  ;;  %v2206_v61 = vld [vmem:[%s2240_s2 + $0x18] sm:$0xff]  ;;  %v1355_v63 = vsel %vm1354_vm6, %v1201_v59, 0.0 }
 0x310   :  { %v1356_v2 = vrot.slane %v1355_v63, 4 }
 0x311   :  { %v769_v4 = vsel %vm759_vm5, %v758_v3, -inf }
 0x312   :  { %770 = vmax.xlane.f32.xlu0 %v769_v4  ;;  %v1376_v4 = vsel %vm1354_vm6, %v2206_v61, 0.0 }
 0x38f   :  { %v762_v5 = vpop.xlane.xlu0 %761 }
 0x390   :  { %v772_v6 = vsub.f32 %v755_v45, %v762_v5  ;;  %v1110_v45 = vld [vmem:[#allocation7 + $0x70] sm:$0xff]  ;;  %v1254_v5 = vsel %vm1253_vm7, %v1201_v59, 0.0 }
 0x392   :  { %v776_v7 = vmul.f32 1.442695, %v772_v6  ;;  %v1357_v6 = vadd.f32 %v1356_v2, %v1355_v63 }
 0x393   :  { %v765_v8 = vpop.xlane.xlu1 %764 }
 0x394   :  { %1889 = vpow2.f32 %v776_v7  ;;  %v773_v9 = vsub.f32 %v756_v53, %v765_v8  ;;  %v1101_v53 = vld [vmem:[#allocation7 + $0x28] sm:$0xff]  ;;  %v1377_v8 = vrot.slane %v1376_v4, 4 }
 0x396   :  { %v778_v10 = vmul.f32 1.442695, %v773_v9  ;;  %v1358_v9 = vrot.slane %v1357_v6, 2 }
 0x397   :  { %v768_v11 = vpop.xlane.xlu0 %767 }
 0x398   :  { %1891 = vpow2.f32 %v778_v10  ;;  %v774_v12 = vsub.f32 %v757_v60, %v768_v11  ;;  %v1202_v60 = vld [vmem:[%s2240_s2 + $0x8] sm:$0xff]  ;;  %v1255_v11 = vrot.slane %v1254_v5, 4  ;;  %s2043_s2 = smov [#allocation10]  }
 0x399   :  { %v1362_v1 = vsel %vm1354_vm6, %v1202_v60, 0.0  ;;  %s1570_s19 = sshll.u32 %s2043_s2, 4  ;;  %s1571_s19 = int_to_ptr.vmem [resolvable:$true] %s1570_s19 }
 0x39a   :  { %v780_v18 = vmul.f32 1.442695, %v774_v12  ;;  %v1378_v12 = vadd.f32 %v1377_v8, %v1376_v4  ;;  %v1445_v8 = vld [vmem:[#allocation8 + $0x78] sm:$0xff]  ;;  %s2001_s20 = scalar_lea.vmem %s1571_s19, 64  ;;  %p2006_p7 = scmp.lt.s32.totalorder %s1571_s19, %s1571_s19 }
 0x39b   :  { %v771_v20 = vpop.xlane.xlu0 %770  ;;  %p2002_p6 = scmp.ne.s32.totalorder %s1571_s19, %s2001_s20  ;;  %p2007_p8 = scmp.lt.s32.totalorder %s2001_s20, %s2001_s20 }
 0x39c   :  { %1893 = vpow2.f32 %v780_v18  ;;  %v775_v21 = vsub.f32 %v758_v3, %v771_v20  ;;  %v1363_v3 = vrot.slane %v1362_v1, 4  ;;  %v1359_v18 = vadd.f32 %v1358_v9, %v1357_v6  ;;  %v1459_v9 = vld [vmem:[#allocation8 + $0xe8] sm:$0xff] }
 0x39d   :  { %p2008_p9 = por %p2007_p8, %p2006_p7 }
 0x39e   :  { %v782_v22 = vmul.f32 1.442695, %v775_v21  ;;  %v1364_v7 = vadd.f32 %v1363_v3, %v1362_v1  ;;  %v1261_v21 = vsel %vm1253_vm7, %v1202_v60, 0.0 }
 0x39f   :  { %p2009_p10 = pnand %p2008_p9, %p2002_p6 }
 0x3a0   :  { %1895 = vpow2.f32 %v782_v22  ;;  %v1365_v10 = vrot.slane %v1364_v7, 2  ;;  %v1379_v22 = vrot.slane %v1378_v12, 2 }
 0x3a1   :  { %v1890_v24 = vpop.eup %1889 }
 0x3a2   :  { %v784_v25 = vsel %vm759_vm5, %v1890_v24, 0.0  ;;  %v1366_v20 = vadd.f32 %v1365_v10, %v1364_v7  ;;  %v1461_v7 = vld [vmem:[#allocation8 + $0xf8] sm:$0xff]  ;;  %v1443_v10 = vld [vmem:[#allocation8 + $0x68] sm:$0xff] }
 0x3a3   :  { %785 = vadd.xlane.f32.xlu1 %v784_v25 }
 0x3a4   :  { %v1367_v25 = vrot.slane %v1366_v20, 1 }
 0x3a5   :  { %v1892_v26 = vpop.eup %1891 }
 0x3a6   :  { %v787_v27 = vsel %vm759_vm5, %v1892_v26, 0.0 }
 0x3a7   :  { %788 = vadd.xlane.f32.xlu0 %v787_v27  ;;  %v1262_v27 = vrot.slane %v1261_v21, 4 }
 0x3a9   :  { %v1894_v28 = vpop.eup %1893 }
 0x3aa   :  { %v790_v29 = vsel %vm759_vm5, %v1894_v28, 0.0 }
 0x3ab   :  { %791 = vadd.xlane.f32.xlu1 %v790_v29 }
 0x3ad   :  { %v1896_v30 = vpop.eup %1895 }
 0x3ae   :  { %v793_v32 = vsel %vm759_vm5, %v1896_v30, 0.0 }
 0x3af   :  { %794 = vadd.xlane.f32.xlu0 %v793_v32  ;;  %v1368_v32 = vadd.f32 %v1367_v25, %v1366_v20  ;;  %v1441_v20 = vld [vmem:[#allocation8 + $0x58] sm:$0xff]  ;;  %v1439_v25 = vld [vmem:[#allocation8 + $0x48] sm:$0xff] }
 0x3bc   :  { %1311 = vperm.xlu1 %1882, %v1201_v59  }
 0x3c5   :  { %1217 = vperm.xlu0 %1880, %v2183_v33  }
 0x3c9   :  { %1885 = vset.pattern.permute.xlu0 %v2041_v62 }
 0x3ca   :  { %1315 = vperm.xlu0 %1885, %v1202_v60  }
 0x42c   :  { %v786_v35 = vpop.xlane.xlu1 %785 }
 0x42d   :  { %1897 = vrcp.f32 %v786_v35  ;;  %v1263_v35 = vadd.f32 %v1262_v27, %v1261_v21  ;;  %v1456_v21 = vld [vmem:[#allocation8 + $0xd0] sm:$0xff]  ;;  %v1438_v27 = vld [vmem:[#allocation8 + $0x40] sm:$0xff] }
 0x430   :  { %v789_v36 = vpop.xlane.xlu0 %788 }
 0x431   :  { %1899 = vrcp.f32 %v789_v36 }
 0x434   :  { %v792_v37 = vpop.xlane.xlu1 %791 }
 0x435   :  { %1901 = vrcp.f32 %v792_v37  ;;  %v1369_v37 = vsel %vm1354_vm6, %v2183_v33, 0.0 }
 0x438   :  { %v795_v38 = vpop.xlane.xlu0 %794 }
 0x439   :  { %1903 = vrcp.f32 %v795_v38 }
 0x43a   :  { %v1898_v39 = vpop.eup %1897 }
 0x43b   :  { %v797_v40 = vmul.f32 %v1898_v39, %v1890_v24  ;;  %v1360_v24 = vrot.slane %v1359_v18, 1  ;;  %v1264_v39 = vrot.slane %v1263_v35, 2 }
 0x43d   :  { %1808 = vmatmul.mubr.msk.f32.vlgmr.msra.gmra.mxu1 %vm759_vm5, %v797_v40  ;;  %v1361_v29 = vadd.f32 %v1360_v24, %v1359_v18  ;;  %v1370_v40 = vrot.slane %v1369_v37, 4  ;;  %v1457_v18 = vld [vmem:[#allocation8 + $0xd8] sm:$0xff]  ;;  %v1455_v24 = vld [vmem:[#allocation8 + $0xc8] sm:$0xff] }
 0x43e   :  { %v1900_v41 = vpop.eup %1899  ;;  %1811 = vmatpush3.msra.mxu1 %v2139_v19  ;;  %1812 = vmatprep.mubr.msk.f32.mxu1 %vm2040_vm4, %v2039_v13  ;;  %v1109_v19 = vld [vmem:[#allocation7 + $0x68] sm:$0xff] }
 0x43f   :  { %1820 = vmatprep.subr.mxu1 %v2039_v13  ;;  %v799_v42 = vmul.f32 %v1900_v41, %v1892_v26  ;;  %v1256_v26 = vadd.f32 %v1255_v11, %v1254_v5  ;;  %1385 = vperm.xlu1 %1882, %v1361_v29   ;;  %v1268_v41 = vsel %vm1253_vm7, %v2183_v33, 0.0  ;;  %v1458_v11 = vld [vmem:[#allocation8 + $0xe0] sm:$0xff]  ;;  %v1437_v29 = vld [vmem:[#allocation8 + $0x38] sm:$0xff] }
 0x441   :  { %1813 = vmatmul.mubr.msk.f32.vlgmr.msra.gmra.mxu1 %vm759_vm5, %v799_v42 }
 0x442   :  { %v1902_v43 = vpop.eup %1901  ;;  %1821 = vmatpush3.msra.mxu1 %v2142_v23  ;;  %1822 = vmatprep.mubr.msk.f32.mxu1 %vm2040_vm4, %v2039_v13  ;;  %v1106_v23 = vld [vmem:[#allocation7 + $0x50] sm:$0xff]  ;;  %v1105_v13 = vld [vmem:[#allocation7 + $0x48] sm:$0xff] }
 0x443   :  { %v801_v44 = vmul.f32 %v1902_v43, %v1894_v28  ;;  %v1380_v28 = vadd.f32 %v1379_v22, %v1378_v12  ;;  %1390 = vperm.xlu1 %1882, %v1368_v32   ;;  %v1265_v43 = vadd.f32 %v1264_v39, %v1263_v35  ;;  %1674 = vmatprep.subr.mxu1 %v1461_v7  ;;  %v1442_v12 = vld [vmem:[#allocation8 + $0x60] sm:$0xff]  ;;  %v1440_v22 = vld [vmem:[#allocation8 + $0x50] sm:$0xff]  ;;  %v1435_v35 = vld [vmem:[#allocation8 + $0x28] sm:$0xff] }
 0x444   :  { %v1436_v32 = vld [vmem:[#allocation8 + $0x30] sm:$0xff]  ;;  %v1433_v39 = vld [vmem:[#allocation8 + $0x18] sm:$0xff] }
 0x445   :  { %1818 = vmatmul.mubr.msk.f32.vlgmr.msra.gmra.mxu0 %vm759_vm5, %v801_v44  ;;  %v1371_v44 = vadd.f32 %v1370_v40, %v1369_v37  ;;  %v1434_v37 = vld [vmem:[#allocation8 + $0x20] sm:$0xff]  ;;  %v1448_v40 = vld [vmem:[#allocation8 + $0x90] sm:$0xff] }
 0x446   :  { %v1904_v46 = vpop.eup %1903  ;;  %1826 = vmatpush3.msra.mxu0 %v1111_v34  ;;  %v1257_v34 = vrot.slane %v1256_v26, 2 }
 0x447   :  { %v803_v47 = vmul.f32 %v1904_v46, %v1896_v30  ;;  %1827 = vmatprep.subr.mxu0 %v1110_v45  ;;  %v1381_v30 = vrot.slane %v1380_v28, 1  ;;  %1883 = vset.pattern.permute.xlu1 %v2037_v0 }
 0x448   :  { %1828 = vmatpush3.msra.mxu0 %v1110_v45  ;;  %v1258_v38 = vadd.f32 %v1257_v34, %v1256_v26  ;;  %1207 = vperm.xlu1 %1883, %v1201_v59   ;;  %v1269_v45 = vrot.slane %v1268_v41, 4  ;;  %v1454_v26 = vld [vmem:[#allocation8 + $0xc0] sm:$0xff]  ;;  %v1451_v34 = vld [vmem:[#allocation8 + $0xa8] sm:$0xff] }
 0x449   :  { %1823 = vmatmul.mubr.msk.f32.vlgmr.msra.gmra.mxu1 %vm759_vm5, %v803_v47  ;;  %1829 = vmatprep.subr.mxu0 %v1109_v19  ;;  %v1382_v36 = vadd.f32 %v1381_v30, %v1380_v28  ;;  %v1372_v47 = vrot.slane %v1371_v44, 2  ;;  %v1453_v28 = vld [vmem:[#allocation8 + $0xb8] sm:$0xff]  ;;  %v1452_v30 = vld [vmem:[#allocation8 + $0xb0] sm:$0xff] }
 0x44a   :  { %1830 = vmatpush3.msra.mxu0 %v1109_v19  ;;  %v1259_v42 = vrot.slane %v1258_v38, 1  ;;  %v1266_v19 = vrot.slane %v1265_v43, 1  ;;  %1675 = vmatpush3.msra.mxu1 %v1445_v8 }
 0x44b   :  { %1831 = vmatprep.subr.mxu0 %v1108_v48  ;;  %1400 = vperm.xlu0 %1885, %v1382_v36   ;;  %v1450_v36 = vld [vmem:[#allocation8 + $0xa0] sm:$0xff] }
 0x44c   :  { %1832 = vmatpush3.msra.mxu0 %v1108_v48  ;;  %1212 = vperm.xlu1 %1883, %v1202_v60   ;;  %v1260_v46 = vadd.f32 %v1259_v42, %v1258_v38  ;;  %v1270_v48 = vadd.f32 %v1269_v45, %v1268_v41  ;;  %v1449_v38 = vld [vmem:[#allocation8 + $0x98] sm:$0xff]  ;;  %v1432_v41 = vld [vmem:[#allocation8 + $0x10] sm:$0xff]  ;;  %v1447_v42 = vld [vmem:[#allocation8 + $0x88] sm:$0xff] }
 0x44d   :  { %1833 = vmatprep.subr.mxu0 %v1107_v49  ;;  %v1430_v45 = vld [vmem:[#allocation8] sm:$0xff] }
 0x44e   :  { %1834 = vmatpush3.msra.mxu0 %v1107_v49  ;;  %v1267_v49 = vadd.f32 %v1266_v19, %v1265_v43  ;;  %v1431_v43 = vld [vmem:[#allocation8 + $0x8] sm:$0xff] }
 0x44f   :  { %1835 = vmatprep.subr.mxu0 %v1106_v23 }
 0x450   :  { %1836 = vmatpush3.msra.mxu0 %v1106_v23  ;;  %1284 = vperm.xlu1 %1883, %v1260_v46   ;;  %v1373_v23 = vadd.f32 %v1372_v47, %v1371_v44  ;;  %v1446_v44 = vld [vmem:[#allocation8 + $0x80] sm:$0xff]  ;;  %v1312_v46 = vpop.permute.xlu1 %1311 }
 0x451   :  { %1837 = vmatprep.subr.mxu0 %v1105_v13 }
 0x452   :  { %1838 = vmatpush3.msra.mxu0 %v1105_v13  ;;  %v1271_v13 = vrot.slane %v1270_v48, 2 }
 0x453   :  { %1839 = vmatprep.subr.mxu0 %v1104_v50 }
 0x454   :  { %1840 = vmatpush3.msra.mxu0 %v1104_v50  ;;  %1289 = vperm.xlu1 %1883, %v1267_v49   ;;  %v1374_v50 = vrot.slane %v1373_v23, 1 }
 0x455   :  { %1841 = vmatprep.subr.mxu0 %v1103_v51 }
 0x456   :  { %1842 = vmatpush3.msra.mxu0 %v1103_v51  ;;  %v1275_v51 = vsel %vm1253_vm7, %v2206_v61, 0.0 }
 0x457   :  { %1843 = vmatprep.subr.mxu0 %v1102_v52 }
 0x458   :  { %1844 = vmatpush3.msra.mxu0 %v1102_v52  ;;  %v1272_v52 = vadd.f32 %v1271_v13, %v1270_v48  ;;  %1884 = vset.pattern.permute.xlu1 %v2041_v62 }
 0x459   :  { %1845 = vmatprep.subr.mxu0 %v1101_v53  ;;  %1319 = vperm.xlu1 %1884, %v2183_v33  }
 0x45a   :  { %1846 = vmatpush3.msra.mxu0 %v1101_v53  ;;  %v1276_v53 = vrot.slane %v1275_v51, 4 }
 0x45b   :  { %1847 = vmatprep.subr.mxu0 %v1100_v54 }
 0x45c   :  { %1848 = vmatpush3.msra.mxu0 %v1100_v54  ;;  %v1375_v54 = vadd.f32 %v1374_v50, %v1373_v23 }
 0x45d   :  { %1849 = vmatprep.subr.mxu0 %v1099_v55 }
 0x45e   :  { %1850 = vmatpush3.msra.mxu0 %v1099_v55  ;;  %v1273_v55 = vrot.slane %v1272_v52, 1  ;;  %1395 = vperm.xlu1 %1884, %v1375_v54  }
 0x45f   :  { %1851 = vmatprep.subr.mxu0 %v1098_v56 }
 0x460   :  { %1852 = vmatpush3.msra.mxu0 %v1098_v56  ;;  %v1277_v56 = vadd.f32 %v1276_v53, %v1275_v51  ;;  %v1218_v53 = vpop.permute.xlu0 %1217 }
 0x461   :  { %1853 = vmatprep.subr.mxu0 %v1097_v57 }
 0x462   :  { %1854 = vmatpush3.msra.mxu0 %v1097_v57  ;;  %v1274_v57 = vadd.f32 %v1273_v55, %v1272_v52  ;;  %1886 = vset.pattern.permute.xlu1 %v2037_v0 }
 0x463   :  { %1855 = vmatprep.subr.mxu0 %v1096_v58 }
 0x464   :  { %1856 = vmatpush3.msra.mxu0 %v1096_v58  ;;  %v1278_v58 = vrot.slane %v1277_v56, 2  ;;  %1294 = vperm.xlu1 %1886, %v1274_v57  }
 0x466   :  { %v1279_v59 = vadd.f32 %v1278_v58, %v1277_v56  ;;  %v1316_v56 = vpop.permute.xlu0 %1315 }
 0x468   :  { %1887 = vset.pattern.permute.xlu1 %v2041_v62  ;;  %v1280_v60 = vrot.slane %v1279_v59, 1 }
 0x469   :  { %1323 = vperm.xlu1 %1887, %v2206_v61  }
 0x46a   :  { %v1281_v33 = vadd.f32 %v1280_v60, %v1279_v59 }
 0x46d   :  { %1888 = vset.pattern.permute.xlu1 %v2037_v0  ;;  %v1460_v0 = vld [vmem:[#allocation8 + $0xf0] sm:$0xff] }
 0x46e   :  { %1222 = vperm.xlu1 %1888, %v2206_v61   ;;  %1676 = vmatprep.subr.mxu1 %v1460_v0  ;;  %v1444_v61 = vld [vmem:[#allocation8 + $0x70] sm:$0xff] }
 0x46f   :  { %1677 = vmatpush3.msra.mxu1 %v1444_v61 }
 0x470   :  { %1678 = vmatprep.subr.mxu1 %v1459_v9 }
 0x471   :  { %1679 = vmatpush3.msra.mxu1 %v1443_v10 }
 0x472   :  { %1299 = vperm.xlu1 %1888, %v1281_v33   ;;  %1680 = vmatprep.subr.mxu1 %v1458_v11 }
 0x473   :  { %1681 = vmatpush3.msra.mxu1 %v1442_v12 }
 0x474   :  { %1682 = vmatprep.subr.mxu1 %v1457_v18 }
 0x475   :  { %1683 = vmatpush3.msra.mxu1 %v1441_v20 }
 0x476   :  { %1684 = vmatprep.subr.mxu1 %v1456_v21 }
 0x477   :  { %1685 = vmatpush3.msra.mxu1 %v1440_v22 }
 0x478   :  { %1686 = vmatprep.subr.mxu1 %v1455_v24 }
 0x479   :  { %1687 = vmatpush3.msra.mxu1 %v1439_v25 }
 0x47a   :  { %1688 = vmatprep.subr.mxu1 %v1454_v26 }
 0x47b   :  { %1689 = vmatpush3.msra.mxu1 %v1438_v27 }
 0x47c   :  { %1690 = vmatprep.subr.mxu1 %v1453_v28 }
 0x47d   :  { %1691 = vmatpush3.msra.mxu1 %v1437_v29 }
 0x47e   :  { %1692 = vmatprep.subr.mxu1 %v1452_v30 }
 0x47f   :  { %1693 = vmatpush3.msra.mxu1 %v1436_v32 }
 0x480   :  { %1694 = vmatprep.subr.mxu1 %v1451_v34 }
 0x481   :  { %1695 = vmatpush3.msra.mxu1 %v1435_v35 }
 0x482   :  { %1696 = vmatprep.subr.mxu1 %v1450_v36 }
 0x483   :  { %1697 = vmatpush3.msra.mxu1 %v1434_v37 }
 0x484   :  { %1698 = vmatprep.subr.mxu1 %v1449_v38 }
 0x485   :  { %1699 = vmatpush3.msra.mxu1 %v1433_v39 }
 0x486   :  { %1700 = vmatprep.subr.mxu1 %v1448_v40 }
 0x487   :  { %1701 = vmatpush3.msra.mxu1 %v1432_v41 }
 0x488   :  { %1702 = vmatprep.subr.mxu1 %v1447_v42 }
 0x489   :  { %1703 = vmatpush3.msra.mxu1 %v1431_v43 }
 0x48a   :  { %1704 = vmatprep.subr.mxu1 %v1446_v44 }
 0x48b   :  { %1705 = vmatpush3.msra.mxu1 %v1430_v45 }
 0x4ba   :  { %v1386_v19 = vpop.permute.xlu1 %1385 }
 0x4bb   :  { %1905 = vrcp.f32 %v1386_v19 }
 0x4be   :  { %v1391_v47 = vpop.permute.xlu1 %1390 }
 0x4bf   :  { %1907 = vrcp.f32 %v1391_v47 }
 0x4c3   :  { %v1208_v48 = vpop.permute.xlu1 %1207 }
 0x4c6   :  { %v1401_v61 = vpop.permute.xlu0 %1400 }
 0x4c7   :  { %v1213_v49 = vpop.permute.xlu1 %1212 }
 0x4c8   :  { %v1906_v34 = vpop.eup %1905 }
 0x4cb   :  { %v1285_v23 = vpop.permute.xlu1 %1284 }
 0x4cc   :  { %1909 = vrcp.f32 %v1285_v23  ;;  %v1908_v39 = vpop.eup %1907 }
 0x4cf   :  { %v1290_v13 = vpop.permute.xlu1 %1289 }
 0x4d0   :  { %1911 = vrcp.f32 %v1290_v13 }
 0x4d4   :  { %v1320_v50 = vpop.permute.xlu1 %1319 }
 0x4d9   :  { %v1396_v51 = vpop.permute.xlu1 %1395  ;;  %v1910_v45 = vpop.eup %1909 }
 0x4da   :  { %1913 = vrcp.f32 %v1396_v51 }
 0x4dd   :  { %v1912_v13 = vpop.eup %1911 }
 0x4df   :  { %v1295_v52 = vpop.permute.xlu1 %1294 }
 0x4e0   :  { %1915 = vrcp.f32 %v1295_v52 }
 0x4e1   :  { %1917 = vrcp.f32 %v1401_v61 }
 0x4e4   :  { %v1324_v54 = vpop.permute.xlu1 %1323 }
 0x4e7   :  { %v1914_v52 = vpop.eup %1913 }
 0x4fd   :  { %v873_v63 = vpop.f32.mrf.mxu1 }
 0x4fe   :  { %1857 = vmatprep.mubr.f32.mxu0 %v873_v63  ;;  %v1223_v63 = vpop.permute.xlu1 %1222 }
 0x4ff   :  { %v1809_v1 = vpop.f32.mrf.mxu1 }
 0x501   :  { %v946_v2 = vpop.f32.mrf.mxu1 }
 0x502   :  { %1858 = vmatmul.mubr.f32.vlgmr.msra.gmra.mxu0 %v946_v2  ;;  %v1300_v9 = vpop.permute.xlu1 %1299 }
 0x503   :  { %v1814_v3 = vpop.f32.mrf.mxu1  ;;  %1919 = vrcp.f32 %v1300_v9 }
 0x505   :  { %v1019_v4 = vpop.f32.mrf.mxu0 }
 0x506   :  { %1860 = vmatprep.mubr.f32.mxu0 %v1019_v4 }
 0x507   :  { %v1819_v5 = vpop.f32.mrf.mxu0 }
 0x509   :  { %v1092_v6 = vpop.f32.mrf.mxu1 }
 0x50a   :  { %1861 = vmatmul.mubr.f32.gmra.mxu0 %v1092_v6 }
 0x50b   :  { %v1824_v62 = vpop.f32.mrf.mxu1 }
 0x5c2   :  { %v1859_v55 = vpop.f32.mrf.mxu0 }
 0x5c3   :  { %v1198_v57 = vadd.f32 %v1859_v55, %v2116_v14 }
 0x5c4   :  { %v1178_v58 = vpop.f32.mrf.mxu0 }
 0x5c5   :  { %v1226_v59 = vmul.f32 %v1213_v49, %v1198_v57  ;;  %v1327_v60 = vmul.f32 %v1316_v56, %v1198_v57  ;;  %v1197_v33 = vadd.f32 %v1178_v58, %v2118_v15  ;;  %v1916_v57 = vpop.eup %1915 }
 0x5c7   :  { %v1235_v1 = vrot.slane %v1226_v59, 4  ;;  %v1336_v2 = vrot.slane %v1327_v60, 4  ;;  %v1225_v3 = vmul.f32 %v1208_v48, %v1197_v33  ;;  %v1326_v4 = vmul.f32 %v1312_v46, %v1197_v33 }
 0x5c9   :  { %v1236_v5 = vadd.f32 %v1235_v1, %v1226_v59  ;;  %v1337_v6 = vadd.f32 %v1336_v2, %v1327_v60  ;;  %v1229_v62 = vrot.slane %v1225_v3, 4  ;;  %v1330_v7 = vrot.slane %v1326_v4, 4 }
 0x5ca   :  { %v1862_v8 = vpop.f32.mrf.mxu0 }
 0x5cb   :  { %v1230_v14 = vadd.f32 %v1229_v62, %v1225_v3  ;;  %v1331_v0 = vadd.f32 %v1330_v7, %v1326_v4  ;;  %v1200_v15 = vadd.f32 %v1862_v8, %v2124_v16  ;;  %v1237_v11 = vrot.slane %v1236_v5, 2 }
 0x5cc   :  { %v1188_v10 = vpop.f32.mrf.mxu0  ;;  %v1338_v12 = vrot.slane %v1337_v6, 2 }
 0x5cd   :  { %v1231_v18 = vrot.slane %v1230_v14, 2  ;;  %v1332_v20 = vrot.slane %v1331_v0, 2  ;;  %v1228_v21 = vmul.f32 %v1223_v63, %v1200_v15  ;;  %v1329_v22 = vmul.f32 %v1324_v54, %v1200_v15  ;;  %v1918_v63 = vpop.eup %1917 }
 0x5ce   :  { %v1199_v24 = vadd.f32 %v1188_v10, %v2126_v17  ;;  %v1238_v32 = vadd.f32 %v1237_v11, %v1236_v5  ;;  %v1339_v16 = vadd.f32 %v1338_v12, %v1337_v6  ;;  %v1920_v5 = vpop.eup %1919 }
 0x5cf   :  { %v1232_v25 = vadd.f32 %v1231_v18, %v1230_v14  ;;  %v1333_v26 = vadd.f32 %v1332_v20, %v1331_v0  ;;  %v1247_v27 = vrot.slane %v1228_v21, 4  ;;  %v1348_v28 = vrot.slane %v1329_v22, 4 }
 0x5d0   :  { %v1227_v29 = vmul.f32 %v1218_v53, %v1199_v24  ;;  %v1328_v30 = vmul.f32 %v1320_v50, %v1199_v24  ;;  %v1239_v46 = vrot.slane %v1238_v32, 1  ;;  %v1340_v19 = vrot.slane %v1339_v16, 1 }
 0x5d1   :  { %v1248_v35 = vadd.f32 %v1247_v27, %v1228_v21  ;;  %v1349_v36 = vadd.f32 %v1348_v28, %v1329_v22  ;;  %v1233_v40 = vrot.slane %v1232_v25, 1  ;;  %v1334_v41 = vrot.slane %v1333_v26, 1 }
 0x5d2   :  { %v1241_v37 = vrot.slane %v1227_v29, 4  ;;  %v1342_v38 = vrot.slane %v1328_v30, 4  ;;  %v1240_v58 = vadd.f32 %v1239_v46, %v1238_v32  ;;  %v1341_v59 = vadd.f32 %v1340_v19, %v1339_v16 }
 0x5d3   :  { %v1249_v42 = vrot.slane %v1248_v35, 2  ;;  %v1350_v43 = vrot.slane %v1349_v36, 2  ;;  %v1234_v50 = vadd.f32 %v1233_v40, %v1232_v25  ;;  %v1335_v51 = vadd.f32 %v1334_v41, %v1333_v26 }
 0x5d4   :  { %v1242_v17 = vadd.f32 %v1241_v37, %v1227_v29  ;;  %v1343_v44 = vadd.f32 %v1342_v38, %v1328_v30  ;;  %v1305_v7 = vmul.f32 %v1912_v13, %v1240_v58  ;;  %v1406_v8 = vmul.f32 %v1908_v39, %v1341_v59 }
 0x5d5   :  { %v1250_v47 = vadd.f32 %v1249_v42, %v1248_v35  ;;  %v1351_v48 = vadd.f32 %v1350_v43, %v1349_v36  ;;  %v1303_v1 = vmul.f32 %v1910_v45, %v1234_v50  ;;  %v1404_v2 = vmul.f32 %v1906_v34, %v1335_v51 }
 0x5d6   :  { %v1243_v49 = vrot.slane %v1242_v17, 2  ;;  %v1344_v23 = vrot.slane %v1343_v44, 2  ;;  %v2042_v21 = vmov 1966171168  }
 0x5d7   :  { %v1251_v53 = vrot.slane %v1250_v47, 1  ;;  %v1352_v54 = vrot.slane %v1351_v48, 1  ;;  %v1426_v15 = vsel %vm1415_vm8, %v1406_v8, %v1404_v2  ;;  %v1416_v10 = vsel %vm1415_vm8, %v1305_v7, %v1303_v1 }
 0x5d8   :  { %v1244_v55 = vadd.f32 %v1243_v49, %v1242_v17  ;;  %v1345_v56 = vadd.f32 %v1344_v23, %v1343_v44  ;;  %v1534_v22 = vunpack.c.l.s4 %v2042_v21 }
 0x5d9   :  { %v1252_v3 = vadd.f32 %v1251_v53, %v1250_v47  ;;  %v1353_v4 = vadd.f32 %v1352_v54, %v1351_v48 }
 0x5da   :  { %v1245_v60 = vrot.slane %v1244_v55, 1  ;;  %v1346_v33 = vrot.slane %v1345_v56, 1  ;;  %v1535_v24 = vunpack.c.0.s8 %v1534_v22 }
 0x5db   :  { %v1410_v61 = vmul.f32 %v1918_v63, %v1353_v4  ;;  %v1309_v9 = vmul.f32 %v1920_v5, %v1252_v3 }
 0x5dc   :  { %v1246_v6 = vadd.f32 %v1245_v60, %v1244_v55  ;;  %v1347_v62 = vadd.f32 %v1346_v33, %v1345_v56  ;;  %v1538_v26 = vsub.s32 %v1535_v24, %v2160_v31 }
 0x5de   :  { %v1408_v14 = vmul.f32 %v1914_v52, %v1347_v62  ;;  %v1307_v0 = vmul.f32 %v1916_v57, %v1246_v6 }
 0x5e0   :  { %v1427_v11 = vsel %vm1417_vm9, %v1408_v14, %v1426_v15  ;;  %v1418_v12 = vsel %vm1417_vm9, %v1307_v0, %v1416_v10 }
 0x5e1   :  { %v1428_v18 = vsel %vm1419_vm10, %v1410_v61, %v1427_v11  ;;  %v1420_v20 = vsel %vm1419_vm10, %v1309_v9, %v1418_v12 }
 0x5e2   :  { %1526 = vmatprep.mubr.f32.mxu1 %v1428_v18 }
 0x5e3   :  { %1527 = vmatmul.mubr.f32.vlgmr.msra.gmra.mxu1 %v1420_v20 }
 0x6a3   :  { %v1706_v25 = vpop.f32.mrf.mxu1 }
 0x6a5   :  { %v1707_v27 = vpop.f32.mrf.mxu1 }
 0x6a6   :  { %v1708_v28 = vadd.f32 %v1707_v27, %v1706_v25 }
 0x6a8   :  { %v1539_v29 = vrot.slane %v1708_v28, %v1538_v26 }
 0x6aa   :  { %v1540_v30 = vcombine.high %v1539_v29, %v1539_v29  ;;  %v1547_v32 = vrot.slane %v1539_v29, %v1538_v26  ;;  %1596 = vst.sshfl [vmem:[#allocation10] sm:$0x1 pattern:$0x73625140] %v1539_v29 }
 0x6ac   :  { %v1554_v16 = vrot.slane %v1540_v30, %v1538_v26  ;;  %v1555_v34 = vcombine.high %v1547_v32, %v1547_v32  ;;  %1597 = vst.sshfl [vmem:[#allocation10 + $0x1] sm:$0x1 pattern:$0x73625140] %v1540_v30 }
 0x6ae   :  { %v1556_v35 = vcombine.high %v1554_v16, %v1554_v16  ;;  %1563 = vst [vmem:[#allocation10 + $0x2] sm:$0x1] %v1555_v34 }
 0x6b0   :  { %1564 = vst [vmem:[#allocation10 + $0x3] sm:$0x1] %v1556_v35 }
 0x6b1   :  { %2012 = shalt.err (!%p2009_p10)
}
 0x6b2   :  { %s2044_s21 = smov 16   ;;  %s2045_s3 = smov 1  }
 0x6b3   :  { %1576 = dma.vmem_to_hbm [thread:$0]  %s1571_s19, 64, %s2245_s7, [#allocation4], %s2044_s21, %s2044_s21, %s2045_s3  }
 0x6b4   :  { %2027 = dma.done.wait [#allocation4], 64  }
 0x6b5   :  { %2028 = vsyncadd [#allocation4], 4294967232 }
 0x6b6   :  { %1580 = vsyncpa [#allocation3], 1 }
 0x6b7   :  { %1581 = vsyncpa [#allocation6], 1 }
 0x6b8   :  { %1582 = vsyncpa [#allocation9], 1 }
 0x6b9   :  { %1583 = vsyncpa [#allocation4], 1 }

</bundles_post_ra>
